<compile_context>
chip_gen: v7x
topology: tpu7x:2x2x1
jax: 0.10.0
libtpu: 0.0.40
codegen_flags: <defaults>
</compile_context>

<pallas_src>
from functools import partial

import jax
import jax.numpy as jnp
from jax import lax
from jax.experimental import pallas as pl
from jax.experimental.pallas import tpu as pltpu


V_LANES = 128  # lane-dense vocab padding target


def sender_kernel(*refs, training):
    if training:
        (x1_ref, x2_ref, w1_ref, b1_ref, w2a_ref, w2b_ref, b2_ref,
         g_ref, out_ref) = refs
    else:
        (x1_ref, x2_ref, w1_ref, b1_ref, w2a_ref, w2b_ref, b2_ref,
         out_ref) = refs
        g_ref = None

    rows = out_ref.shape[0]
    v_pad = out_ref.shape[1] // 2

    # ---- layer 1 (shared weights): two bf16 MXU dots, f32 accumulation -----
    w1 = w1_ref[...]                                   # (in, H) bf16, resident
    b1 = b1_ref[...]                                   # (1, H) f32
    x1 = x1_ref[...].astype(w1.dtype)                  # cast in-kernel (VPU)
    x2 = x2_ref[...].astype(w1.dtype)
    h1 = jax.nn.sigmoid(
        jnp.dot(x1, w1, preferred_element_type=jnp.float32) + b1)   # f32
    h2 = jax.nn.sigmoid(
        jnp.dot(x2, w1, preferred_element_type=jnp.float32) + b1)   # f32

    # ---- layer 2: pre-split W2 -> two dots + VPU add (no slice / concat) ---
    w2a = w2a_ref[...]                                 # (H, v_pad) bf16
    w2b = w2b_ref[...]
    logits = (jnp.dot(h1.astype(w2a.dtype), w2a, preferred_element_type=jnp.float32)
              + jnp.dot(h2.astype(w2b.dtype), w2b, preferred_element_type=jnp.float32)
              + b2_ref[...])                           # padded lanes ~ -1e30 (finite!)

    # ---- LogSoftmax(dim=1), single exp pass; padded lanes -> exp == 0 ------
    m = jnp.max(logits, axis=1, keepdims=True)
    z = logits - m
    e = jnp.exp(z)
    s = jnp.sum(e, axis=1, keepdims=True)
    lse = jnp.log(s)
    lp = z - lse                                       # (rows, v_pad) log-probs
    p = e / s                                          # exact divide (tolerances)

    col = lax.broadcasted_iota(jnp.int32, (rows, v_pad), 1)

    # TODO(synk): the PyTorch reference feeds LogSoftmax output to
    # Categorical(probs=...) (which would renormalize negative values) and
    # calls a nonexistent dist.argmax; the intended logits/log-prob semantics
    # are implemented here (sample in training, argmax in eval).
    if training:
        score = lp + g_ref[...]                        # Gumbel-max sampling
    else:
        score = lp                                     # eval: argmax
    mx = jnp.max(score, axis=1, keepdims=True)
    actions = jnp.min(jnp.where(score >= mx, col, v_pad),
                      axis=1, keepdims=True)           # (rows, 1) int32

    onehot = (col == actions).astype(jnp.float32)
    chosen_lp = jnp.sum(lp * onehot, axis=1, keepdims=True)
    # NOTE: b2 padding must stay FINITE (-1e30).  With -inf, p * lp on the
    # padded lanes would be 0 * (-inf) = NaN in the entropy sum.
    entropy = -jnp.sum(p * lp, axis=1, keepdims=True)

    # ---- pack everything into one lane-dense output slab -------------------
    stats = jnp.where(col == 0, actions.astype(jnp.float32),
            jnp.where(col == 1, chosen_lp,
            jnp.where(col == 2, entropy, 0.0)))
    out_ref[:, 0:v_pad] = lp
    out_ref[:, v_pad:2 * v_pad] = stats


def init_params(key, in_size, hidden_size, vocab_len):
    """PyTorch-style Linear init: U(-1/sqrt(fan_in), 1/sqrt(fan_in))."""
    k1, k2, k3, k4 = jax.random.split(key, 4)
    lim1 = 1.0 / jnp.sqrt(in_size)
    lim2 = 1.0 / jnp.sqrt(2 * hidden_size)
    return {
        "w1": jax.random.uniform(k1, (in_size, hidden_size), jnp.float32, -lim1, lim1),
        "b1": jax.random.uniform(k2, (hidden_size,), jnp.float32, -lim1, lim1),
        "w2": jax.random.uniform(k3, (2 * hidden_size, vocab_len), jnp.float32, -lim2, lim2),
        "b2": jax.random.uniform(k4, (vocab_len,), jnp.float32, -lim2, lim2),
    }


def prepare_params(params, *, matmul_dtype=jnp.bfloat16):
    """One-time (hoisted) prep: bf16 weight storage for the MXU, bias reshape,
    W2 pre-split into the h1/h2 halves, and 128-lane padding of the vocab axis
    (W2 zero-padded; b2 padded with the FINITE -1e30 so padded lanes get
    probability exactly 0 without producing NaNs in the entropy)."""
    _, hidden = params["w1"].shape
    vocab = params["w2"].shape[1]
    v_pad = ((vocab + V_LANES - 1) // V_LANES) * V_LANES
    w2 = params["w2"].astype(jnp.float32)
    w2a = jnp.pad(w2[:hidden], ((0, 0), (0, v_pad - vocab))).astype(matmul_dtype)
    w2b = jnp.pad(w2[hidden:], ((0, 0), (0, v_pad - vocab))).astype(matmul_dtype)
    b2 = jnp.pad(params["b2"].astype(jnp.float32).reshape(1, vocab),
                 ((0, 0), (0, v_pad - vocab)), constant_values=-1e30)
    return {
        "w1": params["w1"].astype(matmul_dtype),
        "b1": params["b1"].astype(jnp.float32).reshape(1, hidden),
        "w2a": w2a,
        "w2b": w2b,
        "b2": b2,
    }


def _row_block(n, max_rb=128):
    """Largest power-of-two row block (multiple of 8 sublanes) dividing n."""
    if n % 8 != 0:
        return n
    rb = 8
    while rb * 2 <= max_rb and n % (rb * 2) == 0:
        rb *= 2
    return rb


def _forward_rows(x1, x2, prepared, gumbel, *, training):
    """Row-wise forward: x1/x2 are (N, in_size); one pallas_call, grid over
    row blocks; weights stay VMEM-resident across the grid."""
    n, in_size = x1.shape
    w1, b1 = prepared["w1"], prepared["b1"]
    w2a, w2b, b2 = prepared["w2a"], prepared["w2b"], prepared["b2"]
    v_pad = w2a.shape[1]

    rb = _row_block(n)
    grid = (n // rb,)

    def rows_spec(cols):
        return pl.BlockSpec((rb, cols), lambda i: (i, 0))

    def resident_spec(arr):
        # Same block index every grid step -> loaded from HBM once, stays in VMEM.
        return pl.BlockSpec(arr.shape, lambda i: (0, 0))

    in_specs = [rows_spec(in_size), rows_spec(in_size),
                resident_spec(w1), resident_spec(b1),
                resident_spec(w2a), resident_spec(w2b), resident_spec(b2)]
    inputs = [x1, x2, w1, b1, w2a, w2b, b2]
    if training:
        in_specs.append(rows_spec(v_pad))
        inputs.append(gumbel)

    packed = pl.pallas_call(
        partial(sender_kernel, training=training),
        out_shape=jax.ShapeDtypeStruct((n, 2 * v_pad), jnp.float32),
        grid=grid,
        in_specs=in_specs,
        out_specs=rows_spec(2 * v_pad),
        compiler_params=pltpu.CompilerParams(
            dimension_semantics=("parallel",)),
    )(*inputs)
    return packed, v_pad


@partial(jax.jit, static_argnames=("vocab_len", "training"))
def sender_net_forward(img1, img2, prepared, key=None, *, vocab_len, training=False):
    """Single forward, matching Sender_Net.forward(img1, img2)."""
    B = img1.shape[0]
    x1 = img1.reshape(B, -1)          # pure reshape (img.view), no concat/copy
    x2 = img2.reshape(B, -1)
    v_pad = prepared["w2a"].shape[1]
    gumbel = jax.random.gumbel(key, (B, v_pad), jnp.float32) if training else None
    packed, v_pad = _forward_rows(x1, x2, prepared, gumbel, training=training)
    lp = packed[:, :vocab_len]
    actions = packed[:, v_pad].astype(jnp.int32)
    logprobs = packed[:, v_pad + 1]
    entropy = packed[:, v_pad + 2]
    return lp, actions, logprobs, entropy


@partial(jax.jit, static_argnames=("vocab_len", "training"))
def sender_net_forward_steps(img1, img2, prepared, key=None, *, vocab_len, training=False):
    """Grid-batched forward over a leading steps axis: img1/img2 are
    (T, B, C, H, W); all T*B rows run in ONE pallas_call with VMEM-resident
    weights (the main launch-overhead lever for an RL rollout)."""
    T, B = img1.shape[:2]
    n = T * B
    x1 = img1.reshape(n, -1)
    x2 = img2.reshape(n, -1)
    v_pad = prepared["w2a"].shape[1]
    gumbel = jax.random.gumbel(key, (n, v_pad), jnp.float32) if training else None
    packed, v_pad = _forward_rows(x1, x2, prepared, gumbel, training=training)
    lp = packed[:, :vocab_len].reshape(T, B, vocab_len)
    actions = packed[:, v_pad].astype(jnp.int32).reshape(T, B)
    logprobs = packed[:, v_pad + 1].reshape(T, B)
    entropy = packed[:, v_pad + 2].reshape(T, B)
    return lp, actions, logprobs, entropy


def reference_forward(params, img1, img2, dtype=jnp.bfloat16):
    """Pure-JAX reference mirroring the kernel's bf16 weight storage with f32
    accumulation and f32 elementwise math."""
    n = img1.shape[0]
    x1 = img1.reshape(n, -1).astype(dtype)
    x2 = img2.reshape(n, -1).astype(dtype)
    w1 = params["w1"].astype(dtype)
    b1 = params["b1"].astype(jnp.float32)
    H = w1.shape[1]
    h1 = jax.nn.sigmoid(jnp.dot(x1, w1, preferred_element_type=jnp.float32) + b1)
    h2 = jax.nn.sigmoid(jnp.dot(x2, w1, preferred_element_type=jnp.float32) + b1)
    w2 = params["w2"].astype(dtype)
    b2 = params["b2"].astype(jnp.float32)
    logits = (jnp.dot(h1.astype(dtype), w2[:H], preferred_element_type=jnp.float32)
              + jnp.dot(h2.astype(dtype), w2[H:], preferred_element_type=jnp.float32)
              + b2)
    lp = jax.nn.log_softmax(logits, axis=1)
    ent = -jnp.sum(jnp.exp(lp) * lp, axis=1)
    return lp, ent


if __name__ == "__main__":
    key = jax.random.PRNGKey(0)
    k_img1, k_img2, k_params, k_s1, k_s2 = jax.random.split(key, 5)

    # Small shapes: batch=2, images (C=4, H=8, W=8) -> in_size=256, hidden=32, vocab=16
    B, C, Hs, Ws = 2, 4, 8, 8
    in_size = C * Hs * Ws
    hidden_size = 32
    vocab_len = 16
    v_pad = V_LANES

    img1 = jax.random.normal(k_img1, (B, C, Hs, Ws), jnp.float32)
    img2 = jax.random.normal(k_img2, (B, C, Hs, Ws), jnp.float32)
    params = init_params(k_params, in_size, hidden_size, vocab_len)
    prepared = prepare_params(params)          # hoisted one-time prep (bf16, padded, split)

    lp_ref, ent_ref = reference_forward(params, img1, img2)
    act_ref = jnp.argmax(lp_ref, axis=1)

    # --- eval path (deterministic argmax) -----------------------------------
    lp, actions, logprobs, entropy = sender_net_forward(
        img1, img2, prepared, vocab_len=vocab_len, training=False)
    jax.block_until_ready((lp, actions, logprobs, entropy))

    assert lp.shape == (B, vocab_len)
    assert jnp.allclose(lp, lp_ref, atol=1e-3), "log-softmax mismatch"
    assert jnp.all(actions == jnp.argmax(lp, axis=1)), "argmax inconsistent with log-probs"
    assert jnp.all(actions == act_ref), "argmax mismatch vs reference"
    assert jnp.allclose(logprobs, lp[jnp.arange(B), actions], atol=1e-6), "logprob mismatch"
    assert jnp.allclose(entropy, ent_ref, atol=1e-3), "entropy mismatch"

    # --- training path (Categorical sampling via Gumbel-max, noise as input) -
    k_sample = jax.random.PRNGKey(1234)
    lp_t, act_t, logp_t, ent_t = sender_net_forward(
        img1, img2, prepared, k_sample, vocab_len=vocab_len, training=True)
    jax.block_until_ready((lp_t, act_t, logp_t, ent_t))

    g = jax.random.gumbel(k_sample, (B, v_pad), jnp.float32)
    exp_act = jnp.argmax(lp_t + g[:, :vocab_len], axis=1)
    assert jnp.allclose(lp_t, lp_ref, atol=1e-3), "train log-softmax mismatch"
    assert jnp.all((act_t >= 0) & (act_t < vocab_len)), "sampled action out of range"
    assert jnp.all(act_t == exp_act), "sampled action mismatch"
    assert jnp.allclose(logp_t, lp_t[jnp.arange(B), act_t], atol=1e-6), "sampled logprob mismatch"
    assert jnp.allclose(ent_t, ent_ref, atol=1e-3), "train entropy mismatch"

    # --- grid-batched multi-step forward (weights stay VMEM-resident) -------
    T = 256                                            # T*B = 512 rows, grid of 4
    img1_steps = jax.random.normal(k_s1, (T, B, C, Hs, Ws), jnp.float32)
    img2_steps = jax.random.normal(k_s2, (T, B, C, Hs, Ws), jnp.float32)
    lp_s, act_s, logp_s, ent_s = sender_net_forward_steps(
        img1_steps, img2_steps, prepared, vocab_len=vocab_len, training=False)
    jax.block_until_ready((lp_s, act_s, logp_s, ent_s))

    lp_sref, ent_sref = reference_forward(
        params, img1_steps.reshape(T * B, C, Hs, Ws),
        img2_steps.reshape(T * B, C, Hs, Ws))
    lp_s_flat = lp_s.reshape(T * B, vocab_len)
    act_s_flat = act_s.reshape(-1)
    assert lp_s.shape == (T, B, vocab_len)
    assert jnp.allclose(lp_s_flat, lp_sref, atol=1e-3), "batched log-softmax mismatch"
    assert jnp.all(act_s_flat == jnp.argmax(lp_s_flat, axis=1)), "batched argmax inconsistent"
    assert jnp.allclose(logp_s.reshape(-1),
                        lp_s_flat[jnp.arange(T * B), act_s_flat], atol=1e-6), \
        "batched logprob mismatch"
    assert jnp.allclose(ent_s.reshape(-1), ent_sref, atol=1e-3), "batched entropy mismatch"

    print("KERNEL_OK")
</pallas_src>

<mosaic_0001>
module attributes {stable_mosaic.version = 11 : i64} {
  func.func @sender_kernel(%arg0: i32, %arg1: memref<2x256xf32, #tpu.memory_space<vmem>>, %arg2: memref<2x256xf32, #tpu.memory_space<vmem>>, %arg3: memref<256x32xbf16, #tpu.memory_space<vmem>>, %arg4: memref<1x32xf32, #tpu.memory_space<vmem>>, %arg5: memref<32x128xbf16, #tpu.memory_space<vmem>>, %arg6: memref<32x128xbf16, #tpu.memory_space<vmem>>, %arg7: memref<1x128xf32, #tpu.memory_space<vmem>>, %arg8: memref<2x256xf32, #tpu.memory_space<vmem>>) attributes {dimension_semantics = [#tpu.dimension_semantics<parallel>], iteration_bounds = array<i64: 1>, scalar_prefetch = 0 : i64, scratch_operands = 0 : i64, tpu.core_type = #tpu.core_type<tc>, window_params = [{transform_indices = @transform_0, window_bounds = array<i64: 2, 256>}, {transform_indices = @transform_1, window_bounds = array<i64: 2, 256>}, {pipeline_mode = #tpu.pipeline_mode<synchronous>, transform_indices = @transform_2, window_bounds = array<i64: 256, 32>}, {pipeline_mode = #tpu.pipeline_mode<synchronous>, transform_indices = @transform_3, window_bounds = array<i64: 1, 32>}, {pipeline_mode = #tpu.pipeline_mode<synchronous>, transform_indices = @transform_4, window_bounds = array<i64: 32, 128>}, {pipeline_mode = #tpu.pipeline_mode<synchronous>, transform_indices = @transform_5, window_bounds = array<i64: 32, 128>}, {pipeline_mode = #tpu.pipeline_mode<synchronous>, transform_indices = @transform_6, window_bounds = array<i64: 1, 128>}, {transform_indices = @transform_7, window_bounds = array<i64: 2, 256>}]} {
    %c0 = arith.constant 0 : index
    %c0_0 = arith.constant 0 : index
    %0 = vector.load %arg3[%c0, %c0_0] : memref<256x32xbf16, #tpu.memory_space<vmem>>, vector<256x32xbf16>
    %c0_1 = arith.constant 0 : index
    %c0_2 = arith.constant 0 : index
    %1 = vector.load %arg4[%c0_1, %c0_2] : memref<1x32xf32, #tpu.memory_space<vmem>>, vector<1x32xf32>
    %c0_3 = arith.constant 0 : index
    %c0_4 = arith.constant 0 : index
    %2 = vector.load %arg1[%c0_3, %c0_4] : memref<2x256xf32, #tpu.memory_space<vmem>>, vector<2x256xf32>
    %3 = arith.truncf %2 : vector<2x256xf32> to vector<2x256xbf16>
    %c0_5 = arith.constant 0 : index
    %c0_6 = arith.constant 0 : index
    %4 = vector.load %arg2[%c0_5, %c0_6] : memref<2x256xf32, #tpu.memory_space<vmem>>, vector<2x256xf32>
    %5 = arith.truncf %4 : vector<2x256xf32> to vector<2x256xbf16>
    %cst = arith.constant dense<0.000000e+00> : vector<2x32xf32>
    %6 = tpu.matmul %3, %0, %cst {dimension_numbers = #tpu.dot_dimension_numbers<[1], [0], [0], [1], [0, 0, 1, 1], [], []>} : vector<2x256xbf16>, vector<256x32xbf16>, vector<2x32xf32> -> vector<2x32xf32>
    %7 = vector.broadcast %1 : vector<1x32xf32> to vector<2x32xf32>
    %8 = arith.addf %6, %7 : vector<2x32xf32>
    %9 = arith.negf %8 : vector<2x32xf32>
    %10 = math.exp %9 : vector<2x32xf32>
    %cst_7 = arith.constant 1.000000e+00 : f32
    %11 = vector.broadcast %cst_7 : f32 to vector<2x32xf32>
    %12 = arith.addf %11, %10 : vector<2x32xf32>
    %13 = arith.divf %11, %12 : vector<2x32xf32>
    %cst_8 = arith.constant dense<0.000000e+00> : vector<2x32xf32>
    %14 = tpu.matmul %5, %0, %cst_8 {dimension_numbers = #tpu.dot_dimension_numbers<[1], [0], [0], [1], [0, 0, 1, 1], [], []>} : vector<2x256xbf16>, vector<256x32xbf16>, vector<2x32xf32> -> vector<2x32xf32>
    %15 = vector.broadcast %1 : vector<1x32xf32> to vector<2x32xf32>
    %16 = arith.addf %14, %15 : vector<2x32xf32>
    %17 = arith.negf %16 : vector<2x32xf32>
    %18 = math.exp %17 : vector<2x32xf32>
    %cst_9 = arith.constant 1.000000e+00 : f32
    %19 = vector.broadcast %cst_9 : f32 to vector<2x32xf32>
    %20 = arith.addf %19, %18 : vector<2x32xf32>
    %21 = arith.divf %19, %20 : vector<2x32xf32>
    %c0_10 = arith.constant 0 : index
    %c0_11 = arith.constant 0 : index
    %22 = vector.load %arg5[%c0_10, %c0_11] : memref<32x128xbf16, #tpu.memory_space<vmem>>, vector<32x128xbf16>
    %c0_12 = arith.constant 0 : index
    %c0_13 = arith.constant 0 : index
    %23 = vector.load %arg6[%c0_12, %c0_13] : memref<32x128xbf16, #tpu.memory_space<vmem>>, vector<32x128xbf16>
    %24 = arith.truncf %13 : vector<2x32xf32> to vector<2x32xbf16>
    %cst_14 = arith.constant dense<0.000000e+00> : vector<2x128xf32>
    %25 = tpu.matmul %24, %22, %cst_14 {dimension_numbers = #tpu.dot_dimension_numbers<[1], [0], [0], [1], [0, 0, 1, 1], [], []>} : vector<2x32xbf16>, vector<32x128xbf16>, vector<2x128xf32> -> vector<2x128xf32>
    %26 = arith.truncf %21 : vector<2x32xf32> to vector<2x32xbf16>
    %cst_15 = arith.constant dense<0.000000e+00> : vector<2x128xf32>
    %27 = tpu.matmul %26, %23, %cst_15 {dimension_numbers = #tpu.dot_dimension_numbers<[1], [0], [0], [1], [0, 0, 1, 1], [], []>} : vector<2x32xbf16>, vector<32x128xbf16>, vector<2x128xf32> -> vector<2x128xf32>
    %28 = arith.addf %25, %27 : vector<2x128xf32>
    %c0_16 = arith.constant 0 : index
    %c0_17 = arith.constant 0 : index
    %29 = vector.load %arg7[%c0_16, %c0_17] : memref<1x128xf32, #tpu.memory_space<vmem>>, vector<1x128xf32>
    %30 = vector.broadcast %29 : vector<1x128xf32> to vector<2x128xf32>
    %31 = arith.addf %28, %30 : vector<2x128xf32>
    %cst_18 = arith.constant dense<0xFF800000> : vector<2xf32>
    %32 = vector.multi_reduction <maximumf>, %31, %cst_18 [1] : vector<2x128xf32> to vector<2xf32>
    %33 = vector.shape_cast %32 : vector<2xf32> to vector<2x1xf32>
    %34 = vector.broadcast %33 : vector<2x1xf32> to vector<2x128xf32>
    %35 = arith.subf %31, %34 : vector<2x128xf32>
    %36 = math.exp %35 : vector<2x128xf32>
    %cst_19 = arith.constant dense<0.000000e+00> : vector<2xf32>
    %37 = vector.multi_reduction <add>, %36, %cst_19 [1] : vector<2x128xf32> to vector<2xf32>
    %38 = vector.shape_cast %37 : vector<2xf32> to vector<2x1xf32>
    %39 = math.log %38 : vector<2x1xf32>
    %40 = vector.broadcast %39 : vector<2x1xf32> to vector<2x128xf32>
    %41 = arith.subf %35, %40 : vector<2x128xf32>
    %42 = vector.broadcast %38 : vector<2x1xf32> to vector<2x128xf32>
    %43 = arith.divf %36, %42 : vector<2x128xf32>
    %44 = tpu.iota {dimensions = array<i32: 1>} : vector<2x128xi32>
    %cst_20 = arith.constant dense<0xFF800000> : vector<2xf32>
    %45 = vector.multi_reduction <maximumf>, %41, %cst_20 [1] : vector<2x128xf32> to vector<2xf32>
    %46 = vector.shape_cast %45 : vector<2xf32> to vector<2x1xf32>
    %47 = vector.broadcast %46 : vector<2x1xf32> to vector<2x128xf32>
    %48 = arith.cmpf oge, %41, %47 : vector<2x128xf32>
    %c128_i32 = arith.constant 128 : i32
    %49 = vector.broadcast %c128_i32 : i32 to vector<2x128xi32>
    %50 = arith.select %48, %44, %49 : vector<2x128xi1>, vector<2x128xi32>
    %cst_21 = arith.constant dense<2147483647> : vector<2xi32>
    %51 = vector.multi_reduction <minsi>, %50, %cst_21 [1] : vector<2x128xi32> to vector<2xi32>
    %52 = vector.shape_cast %51 : vector<2xi32> to vector<2x1xi32>
    %53 = vector.broadcast %52 : vector<2x1xi32> to vector<2x128xi32>
    %54 = arith.cmpi eq, %44, %53 : vector<2x128xi32>
    %55 = arith.extui %54 : vector<2x128xi1> to vector<2x128xi32>
    %56 = arith.sitofp %55 : vector<2x128xi32> to vector<2x128xf32>
    %57 = arith.mulf %41, %56 : vector<2x128xf32>
    %cst_22 = arith.constant dense<0.000000e+00> : vector<2xf32>
    %58 = vector.multi_reduction <add>, %57, %cst_22 [1] : vector<2x128xf32> to vector<2xf32>
    %59 = vector.shape_cast %58 : vector<2xf32> to vector<2x1xf32>
    %60 = arith.mulf %43, %41 : vector<2x128xf32>
    %cst_23 = arith.constant dense<0.000000e+00> : vector<2xf32>
    %61 = vector.multi_reduction <add>, %60, %cst_23 [1] : vector<2x128xf32> to vector<2xf32>
    %62 = vector.shape_cast %61 : vector<2xf32> to vector<2x1xf32>
    %cst_24 = arith.constant 0.000000e+00 : f32
    %63 = vector.broadcast %cst_24 : f32 to vector<2x1xf32>
    %64 = arith.subf %63, %62 : vector<2x1xf32>
    %c0_i32 = arith.constant 0 : i32
    %65 = vector.broadcast %c0_i32 : i32 to vector<2x128xi32>
    %66 = arith.cmpi eq, %44, %65 : vector<2x128xi32>
    %67 = arith.sitofp %52 : vector<2x1xi32> to vector<2x1xf32>
    %c1_i32 = arith.constant 1 : i32
    %68 = vector.broadcast %c1_i32 : i32 to vector<2x128xi32>
    %69 = arith.cmpi eq, %44, %68 : vector<2x128xi32>
    %c2_i32 = arith.constant 2 : i32
    %70 = vector.broadcast %c2_i32 : i32 to vector<2x128xi32>
    %71 = arith.cmpi eq, %44, %70 : vector<2x128xi32>
    %cst_25 = arith.constant 0.000000e+00 : f32
    %72 = vector.shape_cast %64 : vector<2x1xf32> to vector<2x1xf32>
    %73 = vector.broadcast %72 : vector<2x1xf32> to vector<2x128xf32>
    %74 = vector.broadcast %cst_25 : f32 to vector<2x128xf32>
    %75 = arith.select %71, %73, %74 : vector<2x128xi1>, vector<2x128xf32>
    %76 = vector.shape_cast %59 : vector<2x1xf32> to vector<2x1xf32>
    %77 = vector.broadcast %76 : vector<2x1xf32> to vector<2x128xf32>
    %78 = arith.select %69, %77, %75 : vector<2x128xi1>, vector<2x128xf32>
    %79 = vector.shape_cast %67 : vector<2x1xf32> to vector<2x1xf32>
    %80 = vector.broadcast %79 : vector<2x1xf32> to vector<2x128xf32>
    %81 = arith.select %66, %80, %78 : vector<2x128xi1>, vector<2x128xf32>
    %c0_26 = arith.constant 0 : index
    %c0_27 = arith.constant 0 : index
    %82 = vector.load %arg8[%c0_26, %c0_27] : memref<2x256xf32, #tpu.memory_space<vmem>>, vector<2x128xf32>
    tpu.vector_store %arg8[%c0_26, %c0_27], %41 {strides = array<i32>} : memref<2x256xf32, #tpu.memory_space<vmem>>, vector<2x128xf32>,
    %c0_28 = arith.constant 0 : index
    %c128 = arith.constant 128 : index
    %83 = vector.load %arg8[%c0_28, %c128] : memref<2x256xf32, #tpu.memory_space<vmem>>, vector<2x128xf32>
    tpu.vector_store %arg8[%c0_28, %c128], %81 {strides = array<i32>} : memref<2x256xf32, #tpu.memory_space<vmem>>, vector<2x128xf32>,
    return
  }
  func.func @transform_0(%arg0: i32) -> (i32, i32) {
    %c0_i32 = arith.constant 0 : i32
    %c0_i32_0 = arith.constant 0 : i32
    return %arg0, %c0_i32 : i32, i32
  }
  func.func @transform_1(%arg0: i32) -> (i32, i32) {
    %c0_i32 = arith.constant 0 : i32
    %c0_i32_0 = arith.constant 0 : i32
    return %arg0, %c0_i32 : i32, i32
  }
  func.func @transform_2(%arg0: i32) -> (i32, i32) {
    %c0_i32 = arith.constant 0 : i32
    %c0_i32_0 = arith.constant 0 : i32
    %c0_i32_1 = arith.constant 0 : i32
    return %c0_i32, %c0_i32_0 : i32, i32
  }
  func.func @transform_3(%arg0: i32) -> (i32, i32) {
    %c0_i32 = arith.constant 0 : i32
    %c0_i32_0 = arith.constant 0 : i32
    %c0_i32_1 = arith.constant 0 : i32
    return %c0_i32, %c0_i32_0 : i32, i32
  }
  func.func @transform_4(%arg0: i32) -> (i32, i32) {
    %c0_i32 = arith.constant 0 : i32
    %c0_i32_0 = arith.constant 0 : i32
    %c0_i32_1 = arith.constant 0 : i32
    return %c0_i32, %c0_i32_0 : i32, i32
  }
  func.func @transform_5(%arg0: i32) -> (i32, i32) {
    %c0_i32 = arith.constant 0 : i32
    %c0_i32_0 = arith.constant 0 : i32
    %c0_i32_1 = arith.constant 0 : i32
    return %c0_i32, %c0_i32_0 : i32, i32
  }
  func.func @transform_6(%arg0: i32) -> (i32, i32) {
    %c0_i32 = arith.constant 0 : i32
    %c0_i32_0 = arith.constant 0 : i32
    %c0_i32_1 = arith.constant 0 : i32
    return %c0_i32, %c0_i32_0 : i32, i32
  }
  func.func @transform_7(%arg0: i32) -> (i32, i32) {
    %c0_i32 = arith.constant 0 : i32
    %c0_i32_0 = arith.constant 0 : i32
    return %arg0, %c0_i32 : i32, i32
  }
}

</mosaic_0001>

<bundles_post_ra>
// kernel: sender_net_forward.1
= control target key start
LH: loop header
LB: loop body
LE: loop exit
PB: predicated region body
PF: predicated region fallthrough
CT: control target
= control target key end

     0   :  { %v604_v25 = vmov 0.0   ;;  %vm605_vm0 = vmmov 0   ;;  %vm304_vm1 = vcmask 261120   ;;  %vm411_vm2 = vcmask 1041408   ;;  %s737_s2 = inlined_call_operand.vmem [shape: bf16[256,32], index: 2, kind: input, shape index: {}]   ;;  %s738_s0 = inlined_call_operand.vmem [shape: f32[2,256], index: 0, kind: input, shape index: {}]   ;;  %s739_s1 = inlined_call_operand.vmem [shape: f32[2,256], index: 1, kind: input, shape index: {}]   ;;  %s740_s5 = inlined_call_operand.vmem [shape: bf16[32,128], index: 5, kind: input, shape index: {}]   ;;  %s741_s4 = inlined_call_operand.vmem [shape: bf16[32,128], index: 4, kind: input, shape index: {}]   ;;  %s742_s3 = inlined_call_operand.vmem [shape: f32[1,32], index: 3, kind: input, shape index: {}]   ;;  %s743_s6 = inlined_call_operand.vmem [shape: f32[1,128], index: 6, kind: input, shape index: {}]   ;;  %s744_s7 = inlined_call_operand.vmem [shape: f32[2,256], index: 7, kind: output, shape index: {}]  }
   0x1   :  { %v570_v0 = vld [vmem:[%s737_s2 + $0x40] sm:$0xff]   ;;  %v572_v2 = vld [vmem:[%s737_s2 + $0x48] sm:$0xff]   ;;  %v574_v4 = vld [vmem:[%s737_s2 + $0x50] sm:$0xff]  }
   0x2   :  { %v571_v1 = vld [vmem:[%s737_s2] sm:$0xff]   ;;  %502 = vmatprep.subr.bf16.mxu0 %v570_v0  ;;  %524 = vmatprep.subr.bf16.mxu1 %v570_v0  ;;  %v573_v3 = vld [vmem:[%s737_s2 + $0x8] sm:$0xff]   ;;  %v575_v5 = vld [vmem:[%s737_s2 + $0x10] sm:$0xff]  }
   0x3   :  { %503 = vmatpush3.bf16.msra.mxu0 %v571_v1  ;;  %525 = vmatpush3.bf16.msra.mxu1 %v571_v1  ;;  %v576_v6 = vld [vmem:[%s737_s2 + $0x58] sm:$0xff]   ;;  %v578_v8 = vld [vmem:[%s737_s2 + $0x60] sm:$0xff]   ;;  %v580_v10 = vld [vmem:[%s737_s2 + $0x68] sm:$0xff]  }
   0x4   :  { %504 = vmatprep.subr.bf16.mxu0 %v572_v2  ;;  %526 = vmatprep.subr.bf16.mxu1 %v572_v2  ;;  %v577_v7 = vld [vmem:[%s737_s2 + $0x18] sm:$0xff]   ;;  %v579_v9 = vld [vmem:[%s737_s2 + $0x20] sm:$0xff]   ;;  %v581_v15 = vld [vmem:[%s737_s2 + $0x28] sm:$0xff]  }
   0x5   :  { %v473_v11 = vld.sshfl [vmem:[%s738_s0] sm:$0x33 pattern:$0x76325410]  ;;  %v582_v17 = vld [vmem:[%s737_s2 + $0x70] sm:$0xff]   ;;  %v584_v20 = vld [vmem:[%s737_s2 + $0x78] sm:$0xff]  }
   0x6   :  { %v69_v12 = vcombine.high %v473_v11, %v473_v11  ;;  %v474_v13 = vld.sshfl [vmem:[%s739_s1] sm:$0x33 pattern:$0x76325410]  ;;  %v583_v19 = vld [vmem:[%s737_s2 + $0x30] sm:$0xff]   ;;  %v585_v21 = vld [vmem:[%s737_s2 + $0x38] sm:$0xff]   ;;  %v72_v22 = vpack.c.bf16 %v473_v11, %v473_v11 }
   0x7   :  { %505 = vmatpush3.bf16.msra.mxu0 %v573_v3  ;;  %527 = vmatpush3.bf16.msra.mxu1 %v573_v3  ;;  %v83_v14 = vcombine.high %v474_v13, %v474_v13  ;;  %v86_v23 = vpack.c.bf16 %v474_v13, %v474_v13  ;;  %v586_v24 = vld [vmem:[%s740_s5] sm:$0xff]   ;;  %v588_v27 = vld [vmem:[%s740_s5 + $0x8] sm:$0xff]  }
   0x8   :  { %506 = vmatprep.subr.bf16.mxu0 %v574_v4  ;;  %528 = vmatprep.subr.bf16.mxu1 %v574_v4  ;;  %v73_v16 = vpack.c.bf16 %v69_v12, %v69_v12  ;;  %v587_v26 = vld [vmem:[%s741_s4] sm:$0xff]   ;;  %v589_v28 = vld [vmem:[%s741_s4 + $0x8] sm:$0xff]  }
   0x9   :  { %v87_v18 = vpack.c.bf16 %v83_v14, %v83_v14  ;;  %v475_v31 = vld [vmem:[%s742_s3] ss:$0 sm:$0xff] }
   0xa   :  { %222 = vmatprep.mubr.bf16.mxu0 %v73_v16  ;;  %v500_v55 = vld [vmem:[%s743_s6] ss:$0 sm:$0xff] }
   0xb   :  { %507 = vmatpush3.bf16.msra.mxu0 %v575_v5  ;;  %529 = vmatpush3.bf16.msra.mxu1 %v575_v5 }
   0xc   :  { %508 = vmatprep.subr.bf16.mxu0 %v576_v6  ;;  %530 = vmatprep.subr.bf16.mxu1 %v576_v6 }
   0xd   :  { %268 = vmatprep.mubr.bf16.mxu1 %v87_v18 }
   0xf   :  { %509 = vmatpush3.bf16.msra.mxu0 %v577_v7  ;;  %531 = vmatpush3.bf16.msra.mxu1 %v577_v7 }
  0x10   :  { %510 = vmatprep.subr.bf16.mxu0 %v578_v8  ;;  %532 = vmatprep.subr.bf16.mxu1 %v578_v8 }
  0x13   :  { %511 = vmatpush3.bf16.msra.mxu0 %v579_v9  ;;  %533 = vmatpush3.bf16.msra.mxu1 %v579_v9 }
  0x14   :  { %512 = vmatprep.subr.bf16.mxu0 %v580_v10  ;;  %534 = vmatprep.subr.bf16.mxu1 %v580_v10  ;;  %v426_v10 = vlaneseq }
  0x16   :  { %v427_v11 = vand.u32 127, %v426_v10 }
  0x17   :  { %513 = vmatpush3.bf16.msra.mxu0 %v581_v15  ;;  %535 = vmatpush3.bf16.msra.mxu1 %v581_v15 }
  0x18   :  { %514 = vmatprep.subr.bf16.mxu0 %v582_v17  ;;  %536 = vmatprep.subr.bf16.mxu1 %v582_v17  ;;  %vm463_vm6 = vcmp.eq.s32.totalorder %v427_v11, 2  ;;  %vm462_vm7 = vcmp.eq.s32.totalorder %v427_v11, 1  ;;  %vm460_vm8 = vcmp.eq.s32.totalorder %v427_v11, 0 }
  0x1b   :  { %515 = vmatpush3.bf16.msra.mxu0 %v583_v19  ;;  %537 = vmatpush3.bf16.msra.mxu1 %v583_v19 }
  0x1c   :  { %516 = vmatprep.subr.bf16.mxu0 %v584_v20  ;;  %538 = vmatprep.subr.bf16.mxu1 %v584_v20 }
  0x1f   :  { %517 = vmatpush3.bf16.msra.mxu0 %v585_v21  ;;  %539 = vmatpush3.bf16.msra.mxu1 %v585_v21 }
  0x20   :  { %552 = vmatprep.subr.bf16.mxu0 %v604_v25  ;;  %560 = vmatprep.subr.bf16.mxu1 %v604_v25 }
  0x22   :  { %223 = vmatmul.mubr.bf16.vlgmr.msra.gmra.mrb[0].mxu0 %v72_v22  ;;  %269 = vmatmul.mubr.bf16.vlgmr.msra.gmra.mrb[0].mxu1 %v86_v23 }
  0x23   :  { %553 = vmatpush3.bf16.msra.mxu0 %v586_v24  ;;  %561 = vmatpush3.bf16.msra.mxu1 %v587_v26 }
  0x24   :  { %554 = vmatprep.subr.bf16.mxu0 %v604_v25  ;;  %562 = vmatprep.subr.bf16.mxu1 %v604_v25 }
  0x25   :  { %556 = vmatprep.mubr.msk.bf16.mxu0 %vm605_vm0, %v604_v25  ;;  %564 = vmatprep.mubr.msk.bf16.mxu1 %vm605_vm0, %v604_v25 }
  0x27   :  { %555 = vmatpush3.bf16.msra.mxu0 %v588_v27  ;;  %563 = vmatpush3.bf16.msra.mxu1 %v589_v28 }
  0xf5   :  { %v518_v29 = vpop.f32.mrb[0].mxu0  ;;  %v540_v30 = vpop.f32.mrb[0].mxu1 }
  0xf6   :  { %v519_v32 = vpop.f32.mrb[1].mxu0  ;;  %v541_v33 = vpop.f32.mrb[1].mxu1 }
  0xf7   :  { %v520_v34 = vadd.f32 %v519_v32, %v518_v29  ;;  %v542_v35 = vadd.f32 %v541_v33, %v540_v30  ;;  %v521_v36 = vpop.f32.mrb[2].mxu0  ;;  %v543_v37 = vpop.f32.mrb[2].mxu1 }
  0xf8   :  { %v522_v38 = vpop.f32.mrb[3].mxu0  ;;  %v544_v39 = vpop.f32.mrb[3].mxu1 }
  0xf9   :  { %v225_v40 = vadd.f32 %v520_v34, %v475_v31  ;;  %v271_v41 = vadd.f32 %v542_v35, %v475_v31 }
  0xfb   :  { %v492_v42 = vmul.f32 -1.442695, %v225_v40  ;;  %v493_v43 = vmul.f32 -1.442695, %v271_v41 }
  0xfd   :  { %590 = vpow2.f32 %v492_v42 }
  0xfe   :  { %592 = vpow2.f32 %v493_v43 }
 0x107   :  { %v591_v44 = vpop.eup %590 }
 0x108   :  { %v593_v45 = vpop.eup %592  ;;  %v233_v46 = vadd.f32 1.0, %v591_v44 }
 0x109   :  { %v279_v47 = vadd.f32 1.0, %v593_v45 }
 0x10a   :  { %594 = vrcp.f32 %v233_v46 }
 0x10b   :  { %596 = vrcp.f32 %v279_v47 }
 0x114   :  { %v595_v48 = vpop.eup %594 }
 0x115   :  { %v597_v49 = vpop.eup %596  ;;  %v290_v50 = vpack.c.bf16 %v595_v48, %v595_v48 }
 0x116   :  { %v291_v51 = vpack.c.bf16 %v597_v49, %v597_v49 }
 0x117   :  { %565 = vmatmul.mubr.msk.bf16.vlgmr.msra.gmra.mrb[4].mxu1 %vm304_vm1, %v290_v50 }
 0x118   :  { %557 = vmatmul.mubr.msk.bf16.vlgmr.msra.gmra.mrb[4].mxu0 %vm304_vm1, %v291_v51 }
 0x1ea   :  { %v397_v52 = vpop.f32.mrb[4].mxu1 }
 0x1eb   :  { %v342_v53 = vpop.f32.mrb[4].mxu0  ;;  %v566_v54 = vpop.f32.mrb[5].mxu1 }
 0x1ec   :  { %v398_v56 = vadd.f32 %v397_v52, %v342_v53  ;;  %v558_v57 = vpop.f32.mrb[5].mxu0  ;;  %v400_v58 = vpop.f32.mrb[6].mxu1 }
 0x1ed   :  { %v345_v59 = vpop.f32.mrb[6].mxu0  ;;  %v567_v60 = vpop.f32.mrb[7].mxu1 }
 0x1ee   :  { %v559_v61 = vpop.f32.mrb[7].mxu0  ;;  %v410_v62 = vadd.f32 %v500_v55, %v398_v56 }
 0x1f0   :  { %v412_v63 = vsel %vm411_vm2, %v410_v62, -inf }
 0x1f1   :  { %413 = vmax.xlane.f32.xlu0 %v412_v63 }
 0x27e   :  { %v414_v0 = vpop.xlane.xlu0 %413 }
 0x27f   :  { %v415_v1 = vsub.f32 %v410_v62, %v414_v0 }
 0x281   :  { %v416_v2 = vmul.f32 1.442695, %v415_v1 }
 0x283   :  { %598 = vpow2.f32 %v416_v2 }
 0x28d   :  { %v599_v3 = vpop.eup %598 }
 0x28e   :  { %v418_v4 = vsel %vm411_vm2, %v599_v3, 0.0 }
 0x28f   :  { %419 = vadd.xlane.f32.xlu0 %v418_v4 }
 0x31c   :  { %v420_v5 = vpop.xlane.xlu0 %419 }
 0x31d   :  { %600 = vlog2.f32 %v420_v5 }
 0x31e   :  { %602 = vrcp.f32 %v420_v5 }
 0x327   :  { %v601_v6 = vpop.eup %600 }
 0x328   :  { %v422_v7 = vmul.f32 0.6931472, %v601_v6  ;;  %v603_v13 = vpop.eup %602 }
 0x329   :  { %v425_v17 = vmul.f32 %v603_v13, %v599_v3 }
 0x32a   :  { %v423_v8 = vsub.f32 %v415_v1, %v422_v7 }
 0x32c   :  { %v428_v9 = vsel %vm411_vm2, %v423_v8, -inf  ;;  %467 = vst [vmem:[%s744_s7] sm:$0x3] %v423_v8  ;;  %v455_v19 = vmul.f32 %v425_v17, %v423_v8 }
 0x32d   :  { %429 = vmax.xlane.f32.xlu1 %v428_v9 }
 0x32e   :  { %v456_v20 = vsel %vm411_vm2, %v455_v19, 0.0 }
 0x3ba   :  { %v430_v12 = vpop.xlane.xlu1 %429 }
 0x3bb   :  { %vm431_vm3 = vcmp.ge.f32.partialorder %v423_v8, %v430_v12 }
 0x3bc   :  { %v432_v14 = vsel %vm431_vm3, %v427_v11, 128 }
 0x3bd   :  { %v433_v15 = vsel %vm411_vm2, %v432_v14, 2147483647 }
 0x3be   :  { %v435_v16 = vshra.s32 %v433_v15, 16  ;;  %v434_v21 = vand.u32 65535, %v433_v15 }
 0x3c0   :  { %v437_v18 = vcvt.s32.f32 %v435_v16  ;;  %v436_v23 = vcvt.s32.f32 %v434_v21 }
 0x3c2   :  { %438 = vmin.xlane.f32.xlu1 %v437_v18 }
 0x3c6   :  { %457 = vadd.xlane.f32.xlu1 %v456_v20 }
 0x44f   :  { %v439_v22 = vpop.xlane.xlu1 %438 }
 0x450   :  { %vm440_vm4 = vcmp.eq.f32.partialorder %v437_v18, %v439_v22  ;;  %v445_v26 = vcvt.f32.s32 %v439_v22 }
 0x451   :  { %v441_v24 = vsel %vm440_vm4, %v436_v23, inf }
 0x452   :  { %442 = vmin.xlane.f32.xlu0 %v441_v24  ;;  %v446_v28 = vshll.u32 %v445_v26, 16 }
 0x453   :  { %v458_v34 = vpop.xlane.xlu1 %457 }
 0x454   :  { %v459_v35 = vsub.f32 0.0, %v458_v34 }
 0x456   :  { %v464_v36 = vsel %vm463_vm6, %v459_v35, 0.0 }
 0x4df   :  { %v443_v27 = vpop.xlane.xlu0 %442 }
 0x4e0   :  { %v444_v29 = vcvt.f32.s32 %v443_v27 }
 0x4e2   :  { %v447_v30 = vadd.s32 %v446_v28, %v444_v29 }
 0x4e4   :  { %vm448_vm5 = vcmp.eq.s32.totalorder %v427_v11, %v447_v30  ;;  %v461_v37 = vcvt.s32.f32 %v447_v30 }
 0x4e5   :  { %v501_v31 = vsel %vm448_vm5, 1.0, %v604_v25 }
 0x4e6   :  { %v451_v32 = vmul.f32 %v501_v31, %v423_v8 }
 0x4e8   :  { %v452_v33 = vsel %vm411_vm2, %v451_v32, 0.0 }
 0x4e9   :  { %453 = vadd.xlane.f32.xlu0 %v452_v33 }
 0x576   :  { %v454_v38 = vpop.xlane.xlu0 %453 }
 0x577   :  { %v465_v39 = vsel %vm462_vm7, %v454_v38, %v464_v36 }
 0x578   :  { %v466_v40 = vsel %vm460_vm8, %v461_v37, %v465_v39 }
 0x579   :  { %468 = vst [vmem:[%s744_s7 + $0x2] sm:$0x3] %v466_v40 }

</bundles_post_ra>
